<compile_context>
chip_gen: v7x
topology: tpu7x:2x2x1
jax: 0.10.0
libtpu: 0.0.40
codegen_flags: <defaults>
</compile_context>

<pallas_src>
import jax
import jax.numpy as jnp
from jax.experimental import pallas as pl
from jax.experimental.pallas import tpu as pltpu

STATE_DIM = 32
HIDDEN1 = 128
HIDDEN2 = 64
HIDDEN2_PAD = 128      # zero-padded second hidden width (full lane)
ACTION_DIM = 8
OUT_PAD = 128          # padded w3 output columns (MXU-friendly); store uses 8
LN_EPS = 1e-5          # PyTorch LayerNorm default eps
INV_H1 = 1.0 / HIDDEN1
TB_MAX = 512           # max batch-tile rows per grid step


def _round_up(x, m):
    return ((x + m - 1) // m) * m


def _choose_tile(B, tb_max=TB_MAX):
    """Rows per grid step: multiple of 16 (bf16 sublane pack); for mid-size
    batches split into 2 tiles so v7x's two TensorCores both get work."""
    if B <= 64:
        return _round_up(max(B, 1), 16)
    if B <= 2 * tb_max:
        return min(tb_max, _round_up((B + 1) // 2, 32))
    return tb_max


def arbitrage_kernel(x_ref, w1_ref, b1_ref, g_ref, beta_ref,
                     w2_ref, b2_ref, w3_ref, b3_ref, o_ref):
    # x arrives in f32; cast to the matmul dtype in-kernel (free VPU op).
    x = x_ref[...].astype(w1_ref.dtype)

    # Linear(state_dim, 128) + ReLU, f32 MXU accumulation.
    h1 = jnp.dot(x, w1_ref[...], preferred_element_type=jnp.float32) + b1_ref[...]
    h1 = jnp.maximum(h1, 0.0)

    # Single-pass LayerNorm(128) over the feature axis (f32 math, EUP rsqrt).
    s1 = jnp.sum(h1, axis=-1, keepdims=True)
    s2 = jnp.sum(h1 * h1, axis=-1, keepdims=True)
    mean = s1 * INV_H1
    var = s2 * INV_H1 - mean * mean
    h1 = (h1 - mean) * jax.lax.rsqrt(var + LN_EPS)
    h1 = h1 * g_ref[...] + beta_ref[...]

    # Linear(128, 128-padded) + ReLU (real width 64; pad cols are exactly 0).
    h2 = jnp.dot(h1.astype(w2_ref.dtype), w2_ref[...],
                 preferred_element_type=jnp.float32) + b2_ref[...]
    h2 = jnp.maximum(h2, 0.0)

    # Linear(128-padded, 128-padded) on the MXU; only the first ACTION_DIM
    # columns are real -> slice, add bias, tanh, store just those lanes.
    h3 = jnp.dot(h2.astype(w3_ref.dtype), w3_ref[...],
                 preferred_element_type=jnp.float32)
    h3 = h3[:, :ACTION_DIM] + b3_ref[...]
    o_ref[...] = jnp.tanh(h3).astype(o_ref.dtype)


def arbitrage_forward(x, packed_params, *, tb_max=TB_MAX):
    """x: (B, STATE_DIM) float32 -> (B, ACTION_DIM) float32."""
    w1k, b1k, gk, bek, w2k, b2k, w3k, b3k = packed_params
    B = x.shape[0]

    TB = _choose_tile(B, tb_max)
    Bp = _round_up(B, TB)

    xk = x
    if Bp != B:  # pad only the ragged tail; no dtype copy of x in the wrapper
        xk = jnp.pad(x, ((0, Bp - B), (0, 0)))

    # Constant-index, full-array blocks: DMA'd once, then resident in VMEM.
    def full(arr):
        return pl.BlockSpec(arr.shape, lambda i: (0, 0))

    out = pl.pallas_call(
        arbitrage_kernel,
        out_shape=jax.ShapeDtypeStruct((Bp, ACTION_DIM), jnp.float32),
        grid_spec=pltpu.PrefetchScalarGridSpec(
            num_scalar_prefetch=0,
            grid=(Bp // TB,),
            in_specs=[
                pl.BlockSpec((TB, STATE_DIM), lambda i: (i, 0)),  # x (f32, tiled)
                full(w1k),   # (32, 128)   weights, bf16
                full(b1k),   # (1, 128)    bias, f32
                full(gk),    # (1, 128)    LN gamma, f32
                full(bek),   # (1, 128)    LN beta, f32
                full(w2k),   # (128, 128)  padded, bf16
                full(b2k),   # (1, 128)    padded, f32
                full(w3k),   # (128, 128)  padded, bf16
                full(b3k),   # (1, 8)      real-width bias, f32
            ],
            out_specs=pl.BlockSpec((TB, ACTION_DIM), lambda i: (i, 0)),
        ),
        compiler_params=pltpu.CompilerParams(
            dimension_semantics=("parallel",)),
    )(xk, w1k, b1k, gk, bek, w2k, b2k, w3k, b3k)

    if Bp != B:
        out = out[:B]
    return out


def init_params(key):
    """PyTorch-default-like init (uniform +-1/sqrt(fan_in)); semantic shapes."""
    ks = jax.random.split(key, 6)

    def linear(kw, kb, fan_in, fan_out):
        bound = 1.0 / jnp.sqrt(fan_in)
        w = jax.random.uniform(kw, (fan_in, fan_out), jnp.float32, -bound, bound)
        b = jax.random.uniform(kb, (fan_out,), jnp.float32, -bound, bound)
        return w, b

    w1, b1 = linear(ks[0], ks[1], STATE_DIM, HIDDEN1)
    w2, b2 = linear(ks[2], ks[3], HIDDEN1, HIDDEN2)
    w3, b3 = linear(ks[4], ks[5], HIDDEN2, ACTION_DIM)
    gamma = jnp.ones((HIDDEN1,), jnp.float32)
    beta = jnp.zeros((HIDDEN1,), jnp.float32)
    return (w1, b1, gamma, beta, w2, b2, w3, b3)


def prepare_params(params, compute_dtype=jnp.bfloat16):
    """One-time pack: pad hidden widths for the MXU, cast matmul weights."""
    w1, b1, g, beta, w2, b2, w3, b3 = params
    w1k = w1.astype(compute_dtype)
    b1k = b1.reshape(1, HIDDEN1).astype(jnp.float32)
    gk = g.reshape(1, HIDDEN1).astype(jnp.float32)
    bek = beta.reshape(1, HIDDEN1).astype(jnp.float32)
    w2k = jnp.zeros((HIDDEN1, HIDDEN2_PAD), jnp.float32)
    w2k = w2k.at[:, :HIDDEN2].set(w2).astype(compute_dtype)
    b2k = jnp.zeros((1, HIDDEN2_PAD), jnp.float32).at[0, :HIDDEN2].set(b2)
    w3k = jnp.zeros((HIDDEN2_PAD, OUT_PAD), jnp.float32)
    w3k = w3k.at[:HIDDEN2, :ACTION_DIM].set(w3).astype(compute_dtype)
    b3k = b3.reshape(1, ACTION_DIM).astype(jnp.float32)
    return (w1k, b1k, gk, bek, w2k, b2k, w3k, b3k)


def reference_forward(x, params, compute_dtype=jnp.float32):
    """Pure-JAX reference; compute_dtype mirrors the kernel's matmul precision."""
    w1, b1, g, beta, w2, b2, w3, b3 = params
    cd = compute_dtype
    h1 = jnp.dot(x.astype(cd), w1.astype(cd),
                 preferred_element_type=jnp.float32) + b1
    h1 = jnp.maximum(h1, 0.0)
    mean = jnp.mean(h1, axis=-1, keepdims=True)
    var = jnp.mean((h1 - mean) ** 2, axis=-1, keepdims=True)
    h1 = (h1 - mean) / jnp.sqrt(var + LN_EPS) * g + beta
    h2 = jnp.dot(h1.astype(cd), w2.astype(cd),
                 preferred_element_type=jnp.float32) + b2
    h2 = jnp.maximum(h2, 0.0)
    h3 = jnp.dot(h2.astype(cd), w3.astype(cd),
                 preferred_element_type=jnp.float32) + b3
    return jnp.tanh(h3)


if __name__ == "__main__":
    key = jax.random.PRNGKey(0)
    k_x, k_p = jax.random.split(key)

    B = 4  # small example batch (module: state_dim=32 -> action_dim=8)
    x = jax.random.normal(k_x, (B, STATE_DIM), jnp.float32)
    params = init_params(k_p)
    packed = prepare_params(params, compute_dtype=jnp.bfloat16)

    out = jax.block_until_ready(arbitrage_forward(x, packed))
    assert out.shape == (B, ACTION_DIM)

    # Check against a reference with matching (bf16-matmul, f32-accum) precision...
    ref_bf16 = reference_forward(x, params, compute_dtype=jnp.bfloat16)
    assert jnp.allclose(out, ref_bf16, atol=1e-2, rtol=1e-2), \
        "mismatch vs bf16-matmul JAX reference"
    # ...and a sanity check against the full-f32 reference (bounded tanh output).
    ref_f32 = reference_forward(x, params, compute_dtype=jnp.float32)
    assert jnp.allclose(out, ref_f32, atol=5e-2, rtol=5e-2), \
        "mismatch vs f32 JAX reference"

    print("KERNEL_OK")
</pallas_src>

<mosaic_0001>
module attributes {stable_mosaic.version = 11 : i64} {
  func.func @arbitrage_kernel(%arg0: i32, %arg1: memref<16x32xf32, #tpu.memory_space<vmem>>, %arg2: memref<32x128xbf16, #tpu.memory_space<vmem>>, %arg3: memref<1x128xf32, #tpu.memory_space<vmem>>, %arg4: memref<1x128xf32, #tpu.memory_space<vmem>>, %arg5: memref<1x128xf32, #tpu.memory_space<vmem>>, %arg6: memref<128x128xbf16, #tpu.memory_space<vmem>>, %arg7: memref<1x128xf32, #tpu.memory_space<vmem>>, %arg8: memref<128x128xbf16, #tpu.memory_space<vmem>>, %arg9: memref<1x8xf32, #tpu.memory_space<vmem>>, %arg10: memref<16x8xf32, #tpu.memory_space<vmem>>) attributes {dimension_semantics = [#tpu.dimension_semantics<parallel>], iteration_bounds = array<i64: 1>, scalar_prefetch = 0 : i64, scratch_operands = 0 : i64, tpu.core_type = #tpu.core_type<tc>, window_params = [{transform_indices = @transform_0, window_bounds = array<i64: 16, 32>}, {pipeline_mode = #tpu.pipeline_mode<synchronous>, transform_indices = @transform_1, window_bounds = array<i64: 32, 128>}, {pipeline_mode = #tpu.pipeline_mode<synchronous>, transform_indices = @transform_2, window_bounds = array<i64: 1, 128>}, {pipeline_mode = #tpu.pipeline_mode<synchronous>, transform_indices = @transform_3, window_bounds = array<i64: 1, 128>}, {pipeline_mode = #tpu.pipeline_mode<synchronous>, transform_indices = @transform_4, window_bounds = array<i64: 1, 128>}, {pipeline_mode = #tpu.pipeline_mode<synchronous>, transform_indices = @transform_5, window_bounds = array<i64: 128, 128>}, {pipeline_mode = #tpu.pipeline_mode<synchronous>, transform_indices = @transform_6, window_bounds = array<i64: 1, 128>}, {pipeline_mode = #tpu.pipeline_mode<synchronous>, transform_indices = @transform_7, window_bounds = array<i64: 128, 128>}, {pipeline_mode = #tpu.pipeline_mode<synchronous>, transform_indices = @transform_8, window_bounds = array<i64: 1, 8>}, {transform_indices = @transform_9, window_bounds = array<i64: 16, 8>}]} {
    %c0 = arith.constant 0 : index
    %c0_0 = arith.constant 0 : index
    %0 = vector.load %arg1[%c0, %c0_0] : memref<16x32xf32, #tpu.memory_space<vmem>>, vector<16x32xf32>
    %1 = arith.truncf %0 : vector<16x32xf32> to vector<16x32xbf16>
    %c0_1 = arith.constant 0 : index
    %c0_2 = arith.constant 0 : index
    %2 = vector.load %arg2[%c0_1, %c0_2] : memref<32x128xbf16, #tpu.memory_space<vmem>>, vector<32x128xbf16>
    %cst = arith.constant dense<0.000000e+00> : vector<16x128xf32>
    %3 = tpu.matmul %1, %2, %cst {dimension_numbers = #tpu.dot_dimension_numbers<[1], [0], [0], [1], [0, 0, 1, 1], [], []>} : vector<16x32xbf16>, vector<32x128xbf16>, vector<16x128xf32> -> vector<16x128xf32>
    %c0_3 = arith.constant 0 : index
    %c0_4 = arith.constant 0 : index
    %4 = vector.load %arg3[%c0_3, %c0_4] : memref<1x128xf32, #tpu.memory_space<vmem>>, vector<1x128xf32>
    %5 = vector.broadcast %4 : vector<1x128xf32> to vector<16x128xf32>
    %6 = arith.addf %3, %5 : vector<16x128xf32>
    %cst_5 = arith.constant 0.000000e+00 : f32
    %7 = vector.broadcast %cst_5 : f32 to vector<16x128xf32>
    %8 = arith.maximumf %6, %7 : vector<16x128xf32>
    %cst_6 = arith.constant dense<0.000000e+00> : vector<16xf32>
    %9 = vector.multi_reduction <add>, %8, %cst_6 [1] : vector<16x128xf32> to vector<16xf32>
    %10 = vector.shape_cast %9 : vector<16xf32> to vector<16x1xf32>
    %11 = arith.mulf %8, %8 : vector<16x128xf32>
    %cst_7 = arith.constant dense<0.000000e+00> : vector<16xf32>
    %12 = vector.multi_reduction <add>, %11, %cst_7 [1] : vector<16x128xf32> to vector<16xf32>
    %13 = vector.shape_cast %12 : vector<16xf32> to vector<16x1xf32>
    %cst_8 = arith.constant 7.812500e-03 : f32
    %14 = vector.broadcast %cst_8 : f32 to vector<16x1xf32>
    %15 = arith.mulf %10, %14 : vector<16x1xf32>
    %cst_9 = arith.constant 7.812500e-03 : f32
    %16 = vector.broadcast %cst_9 : f32 to vector<16x1xf32>
    %17 = arith.mulf %13, %16 : vector<16x1xf32>
    %18 = arith.mulf %15, %15 : vector<16x1xf32>
    %19 = arith.subf %17, %18 : vector<16x1xf32>
    %20 = vector.broadcast %15 : vector<16x1xf32> to vector<16x128xf32>
    %21 = arith.subf %8, %20 : vector<16x128xf32>
    %cst_10 = arith.constant 9.99999974E-6 : f32
    %22 = vector.broadcast %cst_10 : f32 to vector<16x1xf32>
    %23 = arith.addf %19, %22 : vector<16x1xf32>
    %24 = math.rsqrt %23 : vector<16x1xf32>
    %25 = vector.broadcast %24 : vector<16x1xf32> to vector<16x128xf32>
    %26 = arith.mulf %21, %25 : vector<16x128xf32>
    %c0_11 = arith.constant 0 : index
    %c0_12 = arith.constant 0 : index
    %27 = vector.load %arg4[%c0_11, %c0_12] : memref<1x128xf32, #tpu.memory_space<vmem>>, vector<1x128xf32>
    %28 = vector.broadcast %27 : vector<1x128xf32> to vector<16x128xf32>
    %29 = arith.mulf %26, %28 : vector<16x128xf32>
    %c0_13 = arith.constant 0 : index
    %c0_14 = arith.constant 0 : index
    %30 = vector.load %arg5[%c0_13, %c0_14] : memref<1x128xf32, #tpu.memory_space<vmem>>, vector<1x128xf32>
    %31 = vector.broadcast %30 : vector<1x128xf32> to vector<16x128xf32>
    %32 = arith.addf %29, %31 : vector<16x128xf32>
    %33 = arith.truncf %32 : vector<16x128xf32> to vector<16x128xbf16>
    %c0_15 = arith.constant 0 : index
    %c0_16 = arith.constant 0 : index
    %34 = vector.load %arg6[%c0_15, %c0_16] : memref<128x128xbf16, #tpu.memory_space<vmem>>, vector<128x128xbf16>
    %cst_17 = arith.constant dense<0.000000e+00> : vector<16x128xf32>
    %35 = tpu.matmul %33, %34, %cst_17 {dimension_numbers = #tpu.dot_dimension_numbers<[1], [0], [0], [1], [0, 0, 1, 1], [], []>} : vector<16x128xbf16>, vector<128x128xbf16>, vector<16x128xf32> -> vector<16x128xf32>
    %c0_18 = arith.constant 0 : index
    %c0_19 = arith.constant 0 : index
    %36 = vector.load %arg7[%c0_18, %c0_19] : memref<1x128xf32, #tpu.memory_space<vmem>>, vector<1x128xf32>
    %37 = vector.broadcast %36 : vector<1x128xf32> to vector<16x128xf32>
    %38 = arith.addf %35, %37 : vector<16x128xf32>
    %cst_20 = arith.constant 0.000000e+00 : f32
    %39 = vector.broadcast %cst_20 : f32 to vector<16x128xf32>
    %40 = arith.maximumf %38, %39 : vector<16x128xf32>
    %41 = arith.truncf %40 : vector<16x128xf32> to vector<16x128xbf16>
    %c0_21 = arith.constant 0 : index
    %c0_22 = arith.constant 0 : index
    %42 = vector.load %arg8[%c0_21, %c0_22] : memref<128x128xbf16, #tpu.memory_space<vmem>>, vector<128x128xbf16>
    %cst_23 = arith.constant dense<0.000000e+00> : vector<16x128xf32>
    %43 = tpu.matmul %41, %42, %cst_23 {dimension_numbers = #tpu.dot_dimension_numbers<[1], [0], [0], [1], [0, 0, 1, 1], [], []>} : vector<16x128xbf16>, vector<128x128xbf16>, vector<16x128xf32> -> vector<16x128xf32>
    %44 = vector.extract_strided_slice %43 {offsets = [0, 0], sizes = [16, 8], strides = [1, 1]} : vector<16x128xf32> to vector<16x8xf32>
    %c0_24 = arith.constant 0 : index
    %c0_25 = arith.constant 0 : index
    %45 = vector.load %arg9[%c0_24, %c0_25] : memref<1x8xf32, #tpu.memory_space<vmem>>, vector<1x8xf32>
    %46 = vector.broadcast %45 : vector<1x8xf32> to vector<16x8xf32>
    %47 = arith.addf %44, %46 : vector<16x8xf32>
    %48 = math.tanh %47 : vector<16x8xf32>
    %c0_26 = arith.constant 0 : index
    %c0_27 = arith.constant 0 : index
    %49 = vector.load %arg10[%c0_26, %c0_27] : memref<16x8xf32, #tpu.memory_space<vmem>>, vector<16x8xf32>
    tpu.vector_store %arg10[%c0_26, %c0_27], %48 {strides = array<i32>} : memref<16x8xf32, #tpu.memory_space<vmem>>, vector<16x8xf32>,
    return
  }
  func.func @transform_0(%arg0: i32) -> (i32, i32) {
    %c0_i32 = arith.constant 0 : i32
    %c0_i32_0 = arith.constant 0 : i32
    return %arg0, %c0_i32 : i32, i32
  }
  func.func @transform_1(%arg0: i32) -> (i32, i32) {
    %c0_i32 = arith.constant 0 : i32
    %c0_i32_0 = arith.constant 0 : i32
    %c0_i32_1 = arith.constant 0 : i32
    return %c0_i32, %c0_i32_0 : i32, i32
  }
  func.func @transform_2(%arg0: i32) -> (i32, i32) {
    %c0_i32 = arith.constant 0 : i32
    %c0_i32_0 = arith.constant 0 : i32
    %c0_i32_1 = arith.constant 0 : i32
    return %c0_i32, %c0_i32_0 : i32, i32
  }
  func.func @transform_3(%arg0: i32) -> (i32, i32) {
    %c0_i32 = arith.constant 0 : i32
    %c0_i32_0 = arith.constant 0 : i32
    %c0_i32_1 = arith.constant 0 : i32
    return %c0_i32, %c0_i32_0 : i32, i32
  }
  func.func @transform_4(%arg0: i32) -> (i32, i32) {
    %c0_i32 = arith.constant 0 : i32
    %c0_i32_0 = arith.constant 0 : i32
    %c0_i32_1 = arith.constant 0 : i32
    return %c0_i32, %c0_i32_0 : i32, i32
  }
  func.func @transform_5(%arg0: i32) -> (i32, i32) {
    %c0_i32 = arith.constant 0 : i32
    %c0_i32_0 = arith.constant 0 : i32
    %c0_i32_1 = arith.constant 0 : i32
    return %c0_i32, %c0_i32_0 : i32, i32
  }
  func.func @transform_6(%arg0: i32) -> (i32, i32) {
    %c0_i32 = arith.constant 0 : i32
    %c0_i32_0 = arith.constant 0 : i32
    %c0_i32_1 = arith.constant 0 : i32
    return %c0_i32, %c0_i32_0 : i32, i32
  }
  func.func @transform_7(%arg0: i32) -> (i32, i32) {
    %c0_i32 = arith.constant 0 : i32
    %c0_i32_0 = arith.constant 0 : i32
    %c0_i32_1 = arith.constant 0 : i32
    return %c0_i32, %c0_i32_0 : i32, i32
  }
  func.func @transform_8(%arg0: i32) -> (i32, i32) {
    %c0_i32 = arith.constant 0 : i32
    %c0_i32_0 = arith.constant 0 : i32
    %c0_i32_1 = arith.constant 0 : i32
    return %c0_i32, %c0_i32_0 : i32, i32
  }
  func.func @transform_9(%arg0: i32) -> (i32, i32) {
    %c0_i32 = arith.constant 0 : i32
    %c0_i32_0 = arith.constant 0 : i32
    return %arg0, %c0_i32 : i32, i32
  }
}

</mosaic_0001>

<bundles_post_ra>
// kernel: tpu_custom_call.1
= control target key start
LH: loop header
LB: loop body
LE: loop exit
PB: predicated region body
PF: predicated region fallthrough
CT: control target
= control target key end

     0   :  { %14 = vsyncpa [#allocation3], 0  ;;  %s848_s0 = inlined_call_operand.hbm [shape: f32[16,32], index: 0, kind: input, shape index: {}]   ;;  %s849_s1 = inlined_call_operand.hbm [shape: bf16[32,128], index: 1, kind: input, shape index: {}]   ;;  %s850_s2 = inlined_call_operand.vmem [shape: f32[1,128], index: 2, kind: input, shape index: {}]   ;;  %s851_s3 = inlined_call_operand.vmem [shape: f32[1,128], index: 3, kind: input, shape index: {}]   ;;  %s852_s4 = inlined_call_operand.vmem [shape: f32[1,128], index: 4, kind: input, shape index: {}]   ;;  %s853_s5 = inlined_call_operand.hbm [shape: bf16[128,128], index: 5, kind: input, shape index: {}]   ;;  %s854_s6 = inlined_call_operand.vmem [shape: f32[1,128], index: 6, kind: input, shape index: {}]   ;;  %s855_s7 = inlined_call_operand.hbm [shape: bf16[128,128], index: 7, kind: input, shape index: {}]   ;;  %s856_s8 = inlined_call_operand.vmem [shape: f32[1,8], index: 8, kind: input, shape index: {}]   ;;  %s857_s9 = inlined_call_operand.vmem [shape: f32[16,8], index: 9, kind: output, shape index: {}]  }
   0x1   :  { %15 = vsyncpa [#allocation5], 0 }
   0x2   :  { %16 = vsyncpa [#allocation8], 0  ;;  %s670_s30 = smov [#allocation4]   ;;  %s576_s13 = scalar_lea.hbm %s849_s1, 256 }
   0x3   :  { %s34_s10 = sshll.u32 %s670_s30, 4  ;;  %p577_p0 = scmp.ne.s32.totalorder %s849_s1, %s576_s13  ;;  %s35_s10 = int_to_ptr.vmem [resolvable:$true] %s34_s10 }
   0x4   :  { %p580_p1 = scmp.lt.u32.totalorder %s576_s13, %s849_s1 }
   0x6   :  { %p582_p2 = pnand %p580_p1, %p577_p0 }
   0x8   :  { %585 = shalt.err (!%p582_p2)
}
   0x9   :  { %s586_s18 = scalar_lea.vmem %s35_s10, 256  ;;  %p591_p4 = scmp.lt.s32.totalorder %s35_s10, %s35_s10 }
   0xa   :  { %p587_p3 = scmp.ne.s32.totalorder %s35_s10, %s586_s18  ;;  %p592_p5 = scmp.lt.s32.totalorder %s586_s18, %s586_s18 }
   0xc   :  { %p593_p6 = por %p592_p5, %p591_p4 }
   0xe   :  { %p594_p7 = pnand %p593_p6, %p587_p3 }
  0x10   :  { %597 = shalt.err (!%p594_p7)
}
  0x11   :  { %s671_s19 = smov 64   ;;  %s672_s20 = smov 4  }
  0x12   :  { %40 = dma.hbm_to_vmem [thread:$0]  %s849_s1, 256, %s35_s10, [#allocation5], %s671_s19, %s671_s19, %s672_s20  }
  0x13   :  { %s673_s23 = smov [#allocation2]   ;;  %s598_s27 = scalar_lea.hbm %s848_s0, 256 }
  0x14   :  { %s22_s24 = sshll.u32 %s673_s23, 4  ;;  %p599_p8 = scmp.ne.s32.totalorder %s848_s0, %s598_s27  ;;  %s23_s24 = int_to_ptr.vmem [resolvable:$true] %s22_s24 }
  0x15   :  { %p602_p9 = scmp.lt.u32.totalorder %s598_s27, %s848_s0 }
  0x17   :  { %p604_p10 = pnand %p602_p9, %p599_p8 }
  0x19   :  { %607 = shalt.err (!%p604_p10)
}
  0x1a   :  { %s608_s12 = scalar_lea.vmem %s23_s24, 256  ;;  %p613_p12 = scmp.lt.s32.totalorder %s23_s24, %s23_s24 }
  0x1b   :  { %p609_p11 = scmp.ne.s32.totalorder %s23_s24, %s608_s12  ;;  %p614_p13 = scmp.lt.s32.totalorder %s608_s12, %s608_s12 }
  0x1d   :  { %p615_p0 = por %p614_p13, %p613_p12 }
  0x1f   :  { %p616_p1 = pnand %p615_p0, %p609_p11 }
  0x21   :  { %619 = shalt.err (!%p616_p1)
}
  0x22   :  { %s674_s1 = smov 128   ;;  %s675_s10 = smov 8  }
  0x23   :  { %28 = dma.hbm_to_vmem [thread:$0]  %s848_s0, 256, %s23_s24, [#allocation3], %s674_s1, %s674_s1, %s675_s10  }
  0x24   :  { %s676_s15 = smov [#allocation6]   ;;  %s677_s17 = smov [#allocation7]  }
  0x25   :  { %s52_s16 = sshll.u32 %s676_s15, 4  ;;  %s66_s18 = sshll.u32 %s677_s17, 4  ;;  %s53_s16 = int_to_ptr.vmem [resolvable:$true] %s52_s16  ;;  %s757_s18 = int_to_ptr.vmem [resolvable:$true] %s66_s18 }
  0x26   :  { %s620_s23 = scalar_lea.hbm %s853_s5, 1024 }
  0x27   :  { %p621_p2 = scmp.ne.s32.totalorder %s853_s5, %s620_s23  ;;  %p624_p3 = scmp.lt.u32.totalorder %s620_s23, %s853_s5 }
  0x29   :  { %p626_p4 = pnand %p624_p3, %p621_p2 }
  0x2b   :  { %629 = shalt.err (!%p626_p4)
}
  0x2c   :  { %s630_s0 = scalar_lea.vmem %s53_s16, 1024  ;;  %p635_p6 = scmp.lt.s32.totalorder %s53_s16, %s53_s16 }
  0x2d   :  { %p631_p5 = scmp.ne.s32.totalorder %s53_s16, %s630_s0  ;;  %p636_p7 = scmp.lt.s32.totalorder %s630_s0, %s630_s0 }
  0x2f   :  { %p637_p8 = por %p636_p7, %p635_p6 }
  0x31   :  { %p638_p9 = pnand %p637_p8, %p631_p5 }
  0x33   :  { %641 = shalt.err (!%p638_p9)
}
  0x34   :  { %58 = dma.hbm_to_vmem [thread:$0]  %s853_s5, 1024, %s53_s16, [#allocation5], %s671_s19, %s671_s19, %s672_s20  }
  0x35   :  { %s642_s12 = scalar_lea.hbm %s855_s7, 1024 }
  0x36   :  { %p643_p10 = scmp.ne.s32.totalorder %s855_s7, %s642_s12  ;;  %p646_p11 = scmp.lt.u32.totalorder %s642_s12, %s855_s7 }
  0x38   :  { %p648_p12 = pnand %p646_p11, %p643_p10 }
  0x3a   :  { %651 = shalt.err (!%p648_p12)
}
  0x3b   :  { %s652_s15 = scalar_lea.vmem %s757_s18, 1024  ;;  %p657_p0 = scmp.lt.s32.totalorder %s757_s18, %s757_s18 }
  0x3c   :  { %p653_p13 = scmp.ne.s32.totalorder %s757_s18, %s652_s15  ;;  %p658_p1 = scmp.lt.s32.totalorder %s652_s15, %s652_s15 }
  0x3e   :  { %p659_p2 = por %p658_p1, %p657_p0 }
  0x40   :  { %p660_p3 = pnand %p659_p2, %p653_p13 }
  0x42   :  { %663 = shalt.err (!%p660_p3)
}
  0x43   :  { %72 = dma.hbm_to_vmem [thread:$0]  %s855_s7, 1024, %s757_s18, [#allocation8], %s671_s19, %s671_s19, %s672_s20  }
  0x44   :  { %664 = dma.done.wait [#allocation3], 256  }
  0x45   :  { %665 = vsyncadd [#allocation3], 4294967040 }
  0x46   :  { %666 = dma.done.wait [#allocation5], 1280  }
  0x47   :  { %667 = vsyncadd [#allocation5], 4294966016 }
  0x48   :  { %668 = dma.done.wait [#allocation8], 1024  }
  0x49   :  { %669 = vsyncadd [#allocation8], 4294966272  ;;  %v678_v0 = vmov 0.0   ;;  %vm679_vm0 = vmmov 0   ;;  %v550_v1 = vld [vmem:[#allocation4] sm:$0xff]   ;;  %v551_v2 = vld [vmem:[#allocation4 + $0x8] sm:$0xff]  }
  0x4a   :  { %492 = vmatprep.subr.bf16.mxu0 %v678_v0  ;;  %496 = vmatprep.mubr.msk.bf16.mxu0 %vm679_vm0, %v678_v0  ;;  %v88_v3 = vld [vmem:[#allocation2] sm:$0xff]  ;;  %v89_v4 = vld [vmem:[#allocation2 + $0x8] sm:$0xff]  ;;  %vm114_vm1 = vcmask 261120   ;;  %v447_v6 = vld [vmem:[%s850_s2] ss:$0 sm:$0xff]  ;;  %vm437_vm2 = vcmask 64512  }
  0x4b   :  { %500 = vmatprep.subr.bf16.mxu1 %v678_v0  ;;  %516 = vmatprep.mubr.msk.bf16.mxu1 %vm679_vm0, %v678_v0  ;;  %v90_v5 = vpack.c.bf16 %v89_v4, %v88_v3  ;;  %v552_v17 = vld [vmem:[#allocation6] sm:$0xff]   ;;  %v553_v18 = vld [vmem:[#allocation6 + $0x8] sm:$0xff]   ;;  %v554_v19 = vld [vmem:[#allocation6 + $0x10] sm:$0xff]  }
  0x4c   :  { %493 = vmatpush3.bf16.msra.mxu0 %v550_v1  ;;  %501 = vmatpush3.bf16.msra.mxu1 %v552_v17  ;;  %v555_v20 = vld [vmem:[#allocation6 + $0x18] sm:$0xff]   ;;  %v556_v21 = vld [vmem:[#allocation6 + $0x20] sm:$0xff]   ;;  %v557_v22 = vld [vmem:[#allocation6 + $0x28] sm:$0xff]  }
  0x4d   :  { %494 = vmatprep.subr.bf16.mxu0 %v678_v0  ;;  %502 = vmatprep.subr.bf16.mxu1 %v678_v0  ;;  %v558_v23 = vld [vmem:[#allocation6 + $0x30] sm:$0xff]   ;;  %v559_v24 = vld [vmem:[#allocation6 + $0x38] sm:$0xff]   ;;  %v560_v25 = vld [vmem:[#allocation7] sm:$0xff]  }
  0x4e   :  { %v561_v26 = vld [vmem:[#allocation7 + $0x8] sm:$0xff]   ;;  %v562_v27 = vld [vmem:[#allocation7 + $0x10] sm:$0xff]   ;;  %v563_v28 = vld [vmem:[#allocation7 + $0x18] sm:$0xff]  }
  0x4f   :  { %v564_v29 = vld [vmem:[#allocation7 + $0x20] sm:$0xff]   ;;  %v565_v30 = vld [vmem:[#allocation7 + $0x28] sm:$0xff]   ;;  %v451_v48 = vld [vmem:[%s851_s3] ss:$0 sm:$0xff] }
  0x50   :  { %495 = vmatpush3.bf16.msra.mxu0 %v551_v2  ;;  %503 = vmatpush3.bf16.msra.mxu1 %v553_v18  ;;  %v452_v53 = vld [vmem:[%s852_s4] ss:$0 sm:$0xff]  ;;  %v567_v59 = vld [vmem:[#allocation7 + $0x38] sm:$0xff]  }
  0x51   :  { %520 = vmatprep.subr.bf16.mxu0 %v678_v0  ;;  %504 = vmatprep.subr.bf16.mxu1 %v678_v0  ;;  %v566_v58 = vld [vmem:[#allocation7 + $0x30] sm:$0xff]  }
  0x52   :  { %v453_v60 = vld [vmem:[%s854_s6] ss:$0 sm:$0xff] }
  0x53   :  { %497 = vmatmul.mubr.msk.bf16.vlgmr.msra.gmra.mrb[0].mxu0 %vm114_vm1, %v90_v5 }
  0x54   :  { %536 = vmatprep.mubr.msk.bf16.mxu0 %vm679_vm0, %v678_v0  ;;  %505 = vmatpush3.bf16.msra.mxu1 %v554_v19 }
  0x55   :  { %506 = vmatprep.subr.bf16.mxu1 %v678_v0  ;;  %521 = vmatpush3.bf16.msra.mxu0 %v560_v25 }
  0x56   :  { %522 = vmatprep.subr.bf16.mxu0 %v678_v0 }
  0x58   :  { %507 = vmatpush3.bf16.msra.mxu1 %v555_v20 }
  0x59   :  { %508 = vmatprep.subr.bf16.mxu1 %v678_v0  ;;  %523 = vmatpush3.bf16.msra.mxu0 %v561_v26 }
  0x5a   :  { %524 = vmatprep.subr.bf16.mxu0 %v678_v0 }
  0x5c   :  { %509 = vmatpush3.bf16.msra.mxu1 %v556_v21 }
  0x5d   :  { %510 = vmatprep.subr.bf16.mxu1 %v678_v0  ;;  %525 = vmatpush3.bf16.msra.mxu0 %v562_v27 }
  0x5e   :  { %526 = vmatprep.subr.bf16.mxu0 %v678_v0 }
  0x60   :  { %511 = vmatpush3.bf16.msra.mxu1 %v557_v22 }
  0x61   :  { %512 = vmatprep.subr.bf16.mxu1 %v678_v0  ;;  %527 = vmatpush3.bf16.msra.mxu0 %v563_v28 }
  0x62   :  { %528 = vmatprep.subr.bf16.mxu0 %v678_v0 }
  0x64   :  { %513 = vmatpush3.bf16.msra.mxu1 %v558_v23 }
  0x65   :  { %514 = vmatprep.subr.bf16.mxu1 %v678_v0  ;;  %529 = vmatpush3.bf16.msra.mxu0 %v564_v29 }
  0x66   :  { %530 = vmatprep.subr.bf16.mxu0 %v678_v0 }
  0x68   :  { %515 = vmatpush3.bf16.msra.mxu1 %v559_v24 }
  0x69   :  { %531 = vmatpush3.bf16.msra.mxu0 %v565_v30 }
  0x6a   :  { %532 = vmatprep.subr.bf16.mxu0 %v678_v0 }
  0x6d   :  { %533 = vmatpush3.bf16.msra.mxu0 %v566_v58 }
  0x6e   :  { %534 = vmatprep.subr.bf16.mxu0 %v678_v0  ;;  %v470_v0 = vld [vmem:[%s856_s8] ss:$0 sm:$0xff] }
  0x71   :  { %535 = vmatpush3.bf16.msra.mxu0 %v567_v59 }
 0x126   :  { %v152_v7 = vpop.f32.mrb[0].mxu0 }
 0x127   :  { %v153_v8 = vadd.f32 %v447_v6, %v152_v7  ;;  %v498_v9 = vpop.f32.mrb[1].mxu0 }
 0x128   :  { %v155_v10 = vpop.f32.mrb[2].mxu0 }
 0x129   :  { %v804_v11 = vmax.f32 %v153_v8, 0.0  ;;  %v156_v12 = vadd.f32 %v447_v6, %v155_v10  ;;  %v499_v13 = vpop.f32.mrb[3].mxu0 }
 0x12b   :  { %v806_v14 = vmax.f32 %v156_v12, 0.0  ;;  %161 = vadd.xlane.f32.xlu0 %v804_v11  ;;  %v165_v15 = vmul.f32 %v804_v11, %v804_v11 }
 0x12d   :  { %167 = vadd.xlane.f32.xlu1 %v165_v15  ;;  %v166_v16 = vmul.f32 %v806_v14, %v806_v14 }
 0x12f   :  { %163 = vadd.xlane.f32.xlu0 %v806_v14 }
 0x131   :  { %169 = vadd.xlane.f32.xlu1 %v166_v16 }
 0x1b8   :  { %v162_v31 = vpop.xlane.xlu0 %161 }
 0x1b9   :  { %v171_v32 = vmul.f32 0.0078125, %v162_v31 }
 0x1ba   :  { %v168_v33 = vpop.xlane.xlu1 %167 }
 0x1bb   :  { %v175_v34 = vmul.f32 %v171_v32, %v171_v32  ;;  %v173_v35 = vmul.f32 0.0078125, %v168_v33  ;;  %v179_v45 = vsub.f32 %v804_v11, %v171_v32 }
 0x1bc   :  { %v164_v36 = vpop.xlane.xlu0 %163 }
 0x1bd   :  { %v177_v37 = vsub.f32 %v173_v35, %v175_v34  ;;  %v172_v38 = vmul.f32 0.0078125, %v164_v36 }
 0x1be   :  { %v170_v39 = vpop.xlane.xlu1 %169 }
 0x1bf   :  { %v181_v40 = vadd.f32 1e-05, %v177_v37  ;;  %v176_v41 = vmul.f32 %v172_v38, %v172_v38  ;;  %v174_v42 = vmul.f32 0.0078125, %v170_v39  ;;  %v180_v49 = vsub.f32 %v806_v14, %v172_v38 }
 0x1c1   :  { %568 = vrsqrt.f32 %v181_v40  ;;  %v178_v43 = vsub.f32 %v174_v42, %v176_v41 }
 0x1c3   :  { %v182_v44 = vadd.f32 1e-05, %v178_v43 }
 0x1c5   :  { %570 = vrsqrt.f32 %v182_v44 }
 0x1cb   :  { %v569_v46 = vpop.eup %568 }
 0x1cc   :  { %v185_v47 = vmul.f32 %v569_v46, %v179_v45 }
 0x1ce   :  { %v194_v52 = vmul.f32 %v451_v48, %v185_v47 }
 0x1cf   :  { %v571_v50 = vpop.eup %570 }
 0x1d0   :  { %v186_v51 = vmul.f32 %v571_v50, %v180_v49  ;;  %v203_v55 = vadd.f32 %v452_v53, %v194_v52 }
 0x1d2   :  { %v195_v54 = vmul.f32 %v451_v48, %v186_v51 }
 0x1d4   :  { %v204_v56 = vadd.f32 %v452_v53, %v195_v54 }
 0x1d6   :  { %v205_v57 = vpack.c.bf16 %v204_v56, %v203_v55 }
 0x1d8   :  { %517 = vmatmul.mubr.bf16.vlgmr.msra.gmra.mrb[0].mxu1 %v205_v57 }
 0x2ab   :  { %v311_v61 = vpop.f32.mrb[0].mxu1 }
 0x2ac   :  { %v312_v62 = vadd.f32 %v453_v60, %v311_v61  ;;  %v518_v63 = vpop.f32.mrb[1].mxu1 }
 0x2ad   :  { %v314_v1 = vpop.f32.mrb[2].mxu1 }
 0x2ae   :  { %v315_v2 = vadd.f32 %v453_v60, %v314_v1  ;;  %v519_v3 = vpop.f32.mrb[3].mxu1  ;;  %v318_v4 = vmax.f32 %v312_v62, 0.0 }
 0x2b0   :  { %v319_v5 = vmax.f32 %v315_v2, 0.0 }
 0x2b2   :  { %v320_v6 = vpack.c.bf16 %v319_v5, %v318_v4 }
 0x2b4   :  { %537 = vmatmul.mubr.bf16.vlgmr.msra.gmra.mrb[4].mxu0 %v320_v6 }
 0x387   :  { %v419_v7 = vpop.f32.mrb[4].mxu0 }
 0x388   :  { %v433_v8 = vadd.f32 %v470_v0, %v419_v7  ;;  %v538_v9 = vpop.f32.mrb[5].mxu0 }
 0x389   :  { %v422_v10 = vpop.f32.mrb[6].mxu0 }
 0x38a   :  { %572 = vtanh.f32 %v433_v8  ;;  %v434_v11 = vadd.f32 %v470_v0, %v422_v10  ;;  %v539_v12 = vpop.f32.mrb[7].mxu0 }
 0x38c   :  { %574 = vtanh.f32 %v434_v11 }
 0x394   :  { %v573_v13 = vpop.eup %572 }
 0x395   :  { %438 = vst.msk [vmem:[%s857_s9] sm:$0xff] %vm437_vm2, %v573_v13 }
 0x396   :  { %v575_v14 = vpop.eup %574 }
 0x397   :  { %439 = vst.msk [vmem:[%s857_s9 + $0x8] sm:$0xff] %vm437_vm2, %v575_v14 }
 0x398   :  { %444 = vsyncpa [#allocation3], 1 }
 0x399   :  { %445 = vsyncpa [#allocation5], 1 }
 0x39a   :  { %446 = vsyncpa [#allocation8], 1 }

</bundles_post_ra>
